<compile_context>
chip_gen: v5e
topology: v5e:2x2
jax: 0.10.0
libtpu: 0.0.40
codegen_flags: <defaults>
</compile_context>

<pallas_src>
import functools

import jax
import jax.numpy as jnp
import numpy as np
from jax.experimental import pallas as pl
from jax.experimental.pallas import tpu as pltpu


def _prompt_pool_kernel(x_ref, keys_ref, invk_ref, values_ref,
                        dist_ref, idx_ref, prompts_ref, *, k, eps):
    x = x_ref[...]            # [TB, D]   float32
    keys = keys_ref[...]      # [P, D]    float32
    invk = invk_ref[...]      # [1, P]    1 / max(||k||, eps), precomputed
    vals = values_ref[...]    # [P, L*D]  float32
    tb = x.shape[0]
    p = keys.shape[0]
    ld = vals.shape[1]

    # cosine similarity, torch semantics (each norm clamped to eps separately):
    #   cos = (x . k) * 1/max(||x||, eps) * 1/max(||k||, eps)
    # contract on D directly so keys stays [P, D] lane-major (no keys.T).
    dots = jax.lax.dot_general(
        x, keys, (((1,), (1,)), ((), ())),
        preferred_element_type=jnp.float32,
        precision=jax.lax.Precision.HIGHEST)                       # [TB, P]
    sx = jnp.sum(x * x, axis=-1, keepdims=True)                    # [TB, 1]
    inv_xn = jnp.minimum(jax.lax.rsqrt(sx), 1.0 / eps)             # 1/max(||x||,eps)
    dist = 1.0 - dots * inv_xn * invk                              # [TB, P]

    col = jax.lax.broadcasted_iota(jnp.int32, (tb, p), 1)
    kpad = dist_ref.shape[1]
    out_col = jax.lax.broadcasted_iota(jnp.int32, (tb, kpad), 1)
    dist_acc = jnp.zeros((tb, kpad), jnp.float32)
    idx_acc = jnp.zeros((tb, kpad), jnp.int32)
    big = jnp.float32(jnp.inf)
    sels = []

    # iterative smallest-k selection (ascending, first index wins on ties,
    # matching torch.topk(largest=False) ordering)
    for j in range(k):
        m = jnp.min(dist, axis=-1, keepdims=True)                  # [TB, 1]
        amin = jnp.min(jnp.where(dist == m, col, p),
                       axis=-1, keepdims=True)                     # [TB, 1] int32
        sel = col == amin                                          # one-hot [TB, P]
        sels.append(sel.astype(jnp.float32))
        dist_acc = jnp.where(out_col == j, m, dist_acc)
        idx_acc = jnp.where(out_col == j, amin, idx_acc)
        dist = jnp.where(sel, big, dist)

    # Fused gather: ONE exact one-hot matmul on the MXU for all K selections.
    # Sublane concat (TB is a multiple of 8) -> no lane shifts; row j*TB + b
    # holds the j-th selection of sample b.
    sel_all = jnp.concatenate(sels, axis=0)                        # [K*TB, P]
    g_all = jax.lax.dot_general(
        sel_all, vals, (((1,), (0,)), ((), ())),
        preferred_element_type=jnp.float32,
        precision=jax.lax.Precision.HIGHEST)                       # [K*TB, L*D]

    # lane-dense full-block stores (dist/idx padded to 128 lanes; prompts as
    # a (K, TB, LD) block -- the leading-dim split below is tile-aligned).
    dist_ref[...] = dist_acc
    idx_ref[...] = idx_acc
    prompts_ref[...] = g_all.reshape(k, tb, ld)


def prompt_pool_forward(x, keys, values, *, pool_prompts_per_sample=5,
                        training=True, eps=1e-8):
    """JAX/Pallas equivalent of PromptPool.forward (use_freq=False path)."""
    B = x.shape[0]
    P, D = keys.shape
    L = values.shape[1]
    K = pool_prompts_per_sample
    assert K <= P, "pool_prompts_per_sample must be <= pool_size"
    LD = L * D
    KPAD = 128 * pl.cdiv(K, 128)          # lane-dense width for dist/idx

    x2d = x.reshape(B, D).astype(jnp.float32)
    keys_f32 = keys.astype(jnp.float32)
    values_flat = values.reshape(P, LD).astype(jnp.float32)
    # grid-invariant key norms computed ONCE in the wrapper (not per tile)
    knorm = jnp.sqrt(jnp.sum(keys_f32 * keys_f32, axis=-1, keepdims=True))
    inv_knorm = (1.0 / jnp.maximum(knorm, eps)).reshape(1, P)

    # Large batch tiles: biggest multiple-of-8 tile up to 512 rows, evenly
    # split across grid steps; zero-pad the batch to a whole number of tiles.
    MAX_TB = 512
    B8 = 8 * pl.cdiv(B, 8)
    num_tiles = pl.cdiv(B8, MAX_TB)
    TB = 8 * pl.cdiv(pl.cdiv(B8, num_tiles), 8)
    Bp = TB * num_tiles
    if Bp != B:
        x2d = jnp.pad(x2d, ((0, Bp - B), (0, 0)))
    grid = (num_tiles,)

    # explicit VMEM budget with headroom (matters on v7x's 64 MiB VMEM).
    block_bytes = 4 * (TB * D + P * D + P + P * LD + 2 * TB * KPAD + K * TB * LD)
    vmem_limit = int(min(max(2 * block_bytes + (4 << 20), 16 << 20), 48 << 20))

    dist_pad, idx_pad, prompts_kbl = pl.pallas_call(
        functools.partial(_prompt_pool_kernel, k=K, eps=eps),
        out_shape=(jax.ShapeDtypeStruct((Bp, KPAD), jnp.float32),
                   jax.ShapeDtypeStruct((Bp, KPAD), jnp.int32),
                   jax.ShapeDtypeStruct((K, Bp, LD), jnp.float32)),
        grid=grid,
        in_specs=[pl.BlockSpec((TB, D), lambda i: (i, 0)),
                  pl.BlockSpec((P, D), lambda i: (0, 0)),
                  pl.BlockSpec((1, P), lambda i: (0, 0)),
                  pl.BlockSpec((P, LD), lambda i: (0, 0))],
        out_specs=(pl.BlockSpec((TB, KPAD), lambda i: (i, 0)),
                   pl.BlockSpec((TB, KPAD), lambda i: (i, 0)),
                   pl.BlockSpec((K, TB, LD), lambda i: (0, i, 0))),
        compiler_params=pltpu.CompilerParams(
            dimension_semantics=(pltpu.PARALLEL,),
            vmem_limit_bytes=vmem_limit),
    )(x2d, keys_f32, inv_knorm, values_flat)

    dist_topk = dist_pad[:B, :K]
    idx = idx_pad[:B, :K]
    # (K, B, LD) -> (B, K, LD) -> (B, K*L, D); tiny XLA transpose, free reshape
    prompts = jnp.transpose(prompts_kbl[:, :B, :], (1, 0, 2))
    prompts = prompts.reshape(B, K * L, D).astype(values.dtype)

    # TODO(synk): use_freq=True branch (penalty-scaled distance and the
    # stateful prompt_freq buffer update via torch.unique) is not implemented.
    key_loss = jnp.mean(dist_topk) if training else None
    return prompts, key_loss, idx, dist_topk


def _reference(x, keys, values, k, eps=1e-8):
    """Pure-JAX reference mirroring the PyTorch forward (use_freq=False)."""
    B = x.shape[0]
    P, D = keys.shape
    x2d = x.reshape(B, D).astype(jnp.float32)
    kf = keys.astype(jnp.float32)
    dots = jnp.matmul(x2d, kf.T, precision=jax.lax.Precision.HIGHEST)
    xn = jnp.linalg.norm(x2d, axis=-1, keepdims=True)
    kn = jnp.linalg.norm(kf, axis=-1, keepdims=True)
    # torch.cosine_similarity clamps each norm separately
    cos = dots / (jnp.maximum(xn, eps) * jnp.maximum(kn.T, eps))
    dist = 1.0 - cos
    neg_top, idx = jax.lax.top_k(-dist, k)          # smallest k, ascending
    dist_topk = -neg_top
    prompts = values[idx].reshape(B, -1, D)
    key_loss = jnp.mean(dist_topk)
    return prompts, key_loss, idx, dist_topk


if __name__ == "__main__":
    # Small shapes consistent with the module.
    B, D = 8, 32                 # batch, embedd_dim
    POOL_SIZE = 16               # pool_size
    L = 5                        # pool_prompt_length
    K = 5                        # pool_prompts_per_sample

    root = jax.random.PRNGKey(0)
    k_x, k_keys, k_vals = jax.random.split(root, 3)

    # Deterministic parameter init mirroring __init__: uniform_(0, 0.01)
    keys = jax.random.uniform(k_keys, (POOL_SIZE, D), jnp.float32, 0.0, 0.01)
    values = jax.random.uniform(k_vals, (POOL_SIZE, L, D), jnp.float32, 0.0, 0.01)

    # x: [B, 1, D] so cosine_similarity broadcasts against keys [P, D]
    x = jax.random.normal(k_x, (B, 1, D), jnp.float32)

    prompts, key_loss, idx, dist_topk = prompt_pool_forward(
        x, keys, values, pool_prompts_per_sample=K, training=True)
    jax.block_until_ready(prompts)
    jax.block_until_ready(key_loss)

    # correctness check vs pure-JAX reference
    ref_prompts, ref_loss, ref_idx, ref_dist = _reference(x, keys, values, K)
    np.testing.assert_array_equal(np.asarray(idx), np.asarray(ref_idx))
    np.testing.assert_allclose(np.asarray(dist_topk), np.asarray(ref_dist),
                               atol=1e-5, rtol=1e-5)
    np.testing.assert_allclose(np.asarray(prompts), np.asarray(ref_prompts),
                               atol=1e-6, rtol=1e-5)
    np.testing.assert_allclose(float(key_loss), float(ref_loss),
                               atol=1e-5, rtol=1e-5)
    assert prompts.shape == (B, K * L, D)

    print("KERNEL_OK")
</pallas_src>

<mosaic_0001>
module attributes {stable_mosaic.version = 11 : i64} {
  func.func @_prompt_pool_kernel(%arg0: i32, %arg1: memref<8x32xf32, #tpu.memory_space<vmem>>, %arg2: memref<16x32xf32, #tpu.memory_space<vmem>>, %arg3: memref<1x16xf32, #tpu.memory_space<vmem>>, %arg4: memref<16x160xf32, #tpu.memory_space<vmem>>, %arg5: memref<8x128xf32, #tpu.memory_space<vmem>>, %arg6: memref<8x128xi32, #tpu.memory_space<vmem>>, %arg7: memref<5x8x160xf32, #tpu.memory_space<vmem>>) attributes {dimension_semantics = [#tpu.dimension_semantics<parallel>], iteration_bounds = array<i64: 1>, scalar_prefetch = 0 : i64, scratch_operands = 0 : i64, tpu.core_type = #tpu.core_type<tc>, window_params = [{transform_indices = @transform_0, window_bounds = array<i64: 8, 32>}, {pipeline_mode = #tpu.pipeline_mode<synchronous>, transform_indices = @transform_1, window_bounds = array<i64: 16, 32>}, {pipeline_mode = #tpu.pipeline_mode<synchronous>, transform_indices = @transform_2, window_bounds = array<i64: 1, 16>}, {pipeline_mode = #tpu.pipeline_mode<synchronous>, transform_indices = @transform_3, window_bounds = array<i64: 16, 160>}, {transform_indices = @transform_4, window_bounds = array<i64: 8, 128>}, {transform_indices = @transform_5, window_bounds = array<i64: 8, 128>}, {transform_indices = @transform_6, window_bounds = array<i64: 5, 8, 160>}]} {
    %c0 = arith.constant 0 : index
    %c0_0 = arith.constant 0 : index
    %0 = vector.load %arg1[%c0, %c0_0] : memref<8x32xf32, #tpu.memory_space<vmem>>, vector<8x32xf32>
    %c0_1 = arith.constant 0 : index
    %c0_2 = arith.constant 0 : index
    %1 = vector.load %arg2[%c0_1, %c0_2] : memref<16x32xf32, #tpu.memory_space<vmem>>, vector<16x32xf32>
    %c0_3 = arith.constant 0 : index
    %c0_4 = arith.constant 0 : index
    %2 = vector.load %arg3[%c0_3, %c0_4] : memref<1x16xf32, #tpu.memory_space<vmem>>, vector<1x16xf32>
    %c0_5 = arith.constant 0 : index
    %c0_6 = arith.constant 0 : index
    %3 = vector.load %arg4[%c0_5, %c0_6] : memref<16x160xf32, #tpu.memory_space<vmem>>, vector<16x160xf32>
    %cst = arith.constant dense<0.000000e+00> : vector<8x16xf32>
    %4 = tpu.matmul %0, %1, %cst {dimension_numbers = #tpu.dot_dimension_numbers<[1], [1], [0], [0], [0, 0, 1, 0], [], []>, precision = #tpu.contract_precision<fp32>} : vector<8x32xf32>, vector<16x32xf32>, vector<8x16xf32> -> vector<8x16xf32>
    %5 = arith.mulf %0, %0 : vector<8x32xf32>
    %cst_7 = arith.constant dense<0.000000e+00> : vector<8xf32>
    %6 = vector.multi_reduction <add>, %5, %cst_7 [1] : vector<8x32xf32> to vector<8xf32>
    %7 = vector.shape_cast %6 : vector<8xf32> to vector<8x1xf32>
    %8 = math.rsqrt %7 : vector<8x1xf32>
    %cst_8 = arith.constant 1.000000e+08 : f32
    %9 = vector.broadcast %cst_8 : f32 to vector<8x1xf32>
    %10 = arith.minimumf %8, %9 : vector<8x1xf32>
    %11 = vector.broadcast %10 : vector<8x1xf32> to vector<8x16xf32>
    %12 = arith.mulf %4, %11 : vector<8x16xf32>
    %13 = vector.broadcast %2 : vector<1x16xf32> to vector<8x16xf32>
    %14 = arith.mulf %12, %13 : vector<8x16xf32>
    %cst_9 = arith.constant 1.000000e+00 : f32
    %15 = vector.broadcast %cst_9 : f32 to vector<8x16xf32>
    %16 = arith.subf %15, %14 : vector<8x16xf32>
    %17 = tpu.iota {dimensions = array<i32: 1>} : vector<8x16xi32>
    %18 = tpu.iota {dimensions = array<i32: 1>} : vector<8x128xi32>
    %cst_10 = arith.constant 0.000000e+00 : f32
    %19 = vector.broadcast %cst_10 : f32 to vector<8x128xf32>
    %c0_i32 = arith.constant 0 : i32
    %20 = vector.broadcast %c0_i32 : i32 to vector<8x128xi32>
    %cst_11 = arith.constant dense<0x7F800000> : vector<8xf32>
    %21 = vector.multi_reduction <minimumf>, %16, %cst_11 [1] : vector<8x16xf32> to vector<8xf32>
    %22 = vector.shape_cast %21 : vector<8xf32> to vector<8x1xf32>
    %23 = vector.broadcast %22 : vector<8x1xf32> to vector<8x16xf32>
    %24 = arith.cmpf oeq, %16, %23 : vector<8x16xf32>
    %c16_i32 = arith.constant 16 : i32
    %25 = vector.broadcast %c16_i32 : i32 to vector<8x16xi32>
    %26 = arith.select %24, %17, %25 : vector<8x16xi1>, vector<8x16xi32>
    %cst_12 = arith.constant dense<2147483647> : vector<8xi32>
    %27 = vector.multi_reduction <minsi>, %26, %cst_12 [1] : vector<8x16xi32> to vector<8xi32>
    %28 = vector.shape_cast %27 : vector<8xi32> to vector<8x1xi32>
    %29 = vector.broadcast %28 : vector<8x1xi32> to vector<8x16xi32>
    %30 = arith.cmpi eq, %17, %29 : vector<8x16xi32>
    %31 = arith.extui %30 : vector<8x16xi1> to vector<8x16xi32>
    %32 = arith.sitofp %31 : vector<8x16xi32> to vector<8x16xf32>
    %c0_i32_13 = arith.constant 0 : i32
    %33 = vector.broadcast %c0_i32_13 : i32 to vector<8x128xi32>
    %34 = arith.cmpi eq, %18, %33 : vector<8x128xi32>
    %35 = vector.shape_cast %22 : vector<8x1xf32> to vector<8x1xf32>
    %36 = vector.broadcast %35 : vector<8x1xf32> to vector<8x128xf32>
    %37 = arith.select %34, %36, %19 : vector<8x128xi1>, vector<8x128xf32>
    %c0_i32_14 = arith.constant 0 : i32
    %38 = vector.broadcast %c0_i32_14 : i32 to vector<8x128xi32>
    %39 = arith.cmpi eq, %18, %38 : vector<8x128xi32>
    %40 = vector.shape_cast %28 : vector<8x1xi32> to vector<8x1xi32>
    %41 = vector.broadcast %40 : vector<8x1xi32> to vector<8x128xi32>
    %42 = arith.select %39, %41, %20 : vector<8x128xi1>, vector<8x128xi32>
    %cst_15 = arith.constant 0x7F800000 : f32
    %43 = vector.broadcast %cst_15 : f32 to vector<8x16xf32>
    %44 = arith.select %30, %43, %16 : vector<8x16xi1>, vector<8x16xf32>
    %cst_16 = arith.constant dense<0x7F800000> : vector<8xf32>
    %45 = vector.multi_reduction <minimumf>, %44, %cst_16 [1] : vector<8x16xf32> to vector<8xf32>
    %46 = vector.shape_cast %45 : vector<8xf32> to vector<8x1xf32>
    %47 = vector.broadcast %46 : vector<8x1xf32> to vector<8x16xf32>
    %48 = arith.cmpf oeq, %44, %47 : vector<8x16xf32>
    %c16_i32_17 = arith.constant 16 : i32
    %49 = vector.broadcast %c16_i32_17 : i32 to vector<8x16xi32>
    %50 = arith.select %48, %17, %49 : vector<8x16xi1>, vector<8x16xi32>
    %cst_18 = arith.constant dense<2147483647> : vector<8xi32>
    %51 = vector.multi_reduction <minsi>, %50, %cst_18 [1] : vector<8x16xi32> to vector<8xi32>
    %52 = vector.shape_cast %51 : vector<8xi32> to vector<8x1xi32>
    %53 = vector.broadcast %52 : vector<8x1xi32> to vector<8x16xi32>
    %54 = arith.cmpi eq, %17, %53 : vector<8x16xi32>
    %55 = arith.extui %54 : vector<8x16xi1> to vector<8x16xi32>
    %56 = arith.sitofp %55 : vector<8x16xi32> to vector<8x16xf32>
    %c1_i32 = arith.constant 1 : i32
    %57 = vector.broadcast %c1_i32 : i32 to vector<8x128xi32>
    %58 = arith.cmpi eq, %18, %57 : vector<8x128xi32>
    %59 = vector.shape_cast %46 : vector<8x1xf32> to vector<8x1xf32>
    %60 = vector.broadcast %59 : vector<8x1xf32> to vector<8x128xf32>
    %61 = arith.select %58, %60, %37 : vector<8x128xi1>, vector<8x128xf32>
    %c1_i32_19 = arith.constant 1 : i32
    %62 = vector.broadcast %c1_i32_19 : i32 to vector<8x128xi32>
    %63 = arith.cmpi eq, %18, %62 : vector<8x128xi32>
    %64 = vector.shape_cast %52 : vector<8x1xi32> to vector<8x1xi32>
    %65 = vector.broadcast %64 : vector<8x1xi32> to vector<8x128xi32>
    %66 = arith.select %63, %65, %42 : vector<8x128xi1>, vector<8x128xi32>
    %cst_20 = arith.constant 0x7F800000 : f32
    %67 = vector.broadcast %cst_20 : f32 to vector<8x16xf32>
    %68 = arith.select %54, %67, %44 : vector<8x16xi1>, vector<8x16xf32>
    %cst_21 = arith.constant dense<0x7F800000> : vector<8xf32>
    %69 = vector.multi_reduction <minimumf>, %68, %cst_21 [1] : vector<8x16xf32> to vector<8xf32>
    %70 = vector.shape_cast %69 : vector<8xf32> to vector<8x1xf32>
    %71 = vector.broadcast %70 : vector<8x1xf32> to vector<8x16xf32>
    %72 = arith.cmpf oeq, %68, %71 : vector<8x16xf32>
    %c16_i32_22 = arith.constant 16 : i32
    %73 = vector.broadcast %c16_i32_22 : i32 to vector<8x16xi32>
    %74 = arith.select %72, %17, %73 : vector<8x16xi1>, vector<8x16xi32>
    %cst_23 = arith.constant dense<2147483647> : vector<8xi32>
    %75 = vector.multi_reduction <minsi>, %74, %cst_23 [1] : vector<8x16xi32> to vector<8xi32>
    %76 = vector.shape_cast %75 : vector<8xi32> to vector<8x1xi32>
    %77 = vector.broadcast %76 : vector<8x1xi32> to vector<8x16xi32>
    %78 = arith.cmpi eq, %17, %77 : vector<8x16xi32>
    %79 = arith.extui %78 : vector<8x16xi1> to vector<8x16xi32>
    %80 = arith.sitofp %79 : vector<8x16xi32> to vector<8x16xf32>
    %c2_i32 = arith.constant 2 : i32
    %81 = vector.broadcast %c2_i32 : i32 to vector<8x128xi32>
    %82 = arith.cmpi eq, %18, %81 : vector<8x128xi32>
    %83 = vector.shape_cast %70 : vector<8x1xf32> to vector<8x1xf32>
    %84 = vector.broadcast %83 : vector<8x1xf32> to vector<8x128xf32>
    %85 = arith.select %82, %84, %61 : vector<8x128xi1>, vector<8x128xf32>
    %c2_i32_24 = arith.constant 2 : i32
    %86 = vector.broadcast %c2_i32_24 : i32 to vector<8x128xi32>
    %87 = arith.cmpi eq, %18, %86 : vector<8x128xi32>
    %88 = vector.shape_cast %76 : vector<8x1xi32> to vector<8x1xi32>
    %89 = vector.broadcast %88 : vector<8x1xi32> to vector<8x128xi32>
    %90 = arith.select %87, %89, %66 : vector<8x128xi1>, vector<8x128xi32>
    %cst_25 = arith.constant 0x7F800000 : f32
    %91 = vector.broadcast %cst_25 : f32 to vector<8x16xf32>
    %92 = arith.select %78, %91, %68 : vector<8x16xi1>, vector<8x16xf32>
    %cst_26 = arith.constant dense<0x7F800000> : vector<8xf32>
    %93 = vector.multi_reduction <minimumf>, %92, %cst_26 [1] : vector<8x16xf32> to vector<8xf32>
    %94 = vector.shape_cast %93 : vector<8xf32> to vector<8x1xf32>
    %95 = vector.broadcast %94 : vector<8x1xf32> to vector<8x16xf32>
    %96 = arith.cmpf oeq, %92, %95 : vector<8x16xf32>
    %c16_i32_27 = arith.constant 16 : i32
    %97 = vector.broadcast %c16_i32_27 : i32 to vector<8x16xi32>
    %98 = arith.select %96, %17, %97 : vector<8x16xi1>, vector<8x16xi32>
    %cst_28 = arith.constant dense<2147483647> : vector<8xi32>
    %99 = vector.multi_reduction <minsi>, %98, %cst_28 [1] : vector<8x16xi32> to vector<8xi32>
    %100 = vector.shape_cast %99 : vector<8xi32> to vector<8x1xi32>
    %101 = vector.broadcast %100 : vector<8x1xi32> to vector<8x16xi32>
    %102 = arith.cmpi eq, %17, %101 : vector<8x16xi32>
    %103 = arith.extui %102 : vector<8x16xi1> to vector<8x16xi32>
    %104 = arith.sitofp %103 : vector<8x16xi32> to vector<8x16xf32>
    %c3_i32 = arith.constant 3 : i32
    %105 = vector.broadcast %c3_i32 : i32 to vector<8x128xi32>
    %106 = arith.cmpi eq, %18, %105 : vector<8x128xi32>
    %107 = vector.shape_cast %94 : vector<8x1xf32> to vector<8x1xf32>
    %108 = vector.broadcast %107 : vector<8x1xf32> to vector<8x128xf32>
    %109 = arith.select %106, %108, %85 : vector<8x128xi1>, vector<8x128xf32>
    %c3_i32_29 = arith.constant 3 : i32
    %110 = vector.broadcast %c3_i32_29 : i32 to vector<8x128xi32>
    %111 = arith.cmpi eq, %18, %110 : vector<8x128xi32>
    %112 = vector.shape_cast %100 : vector<8x1xi32> to vector<8x1xi32>
    %113 = vector.broadcast %112 : vector<8x1xi32> to vector<8x128xi32>
    %114 = arith.select %111, %113, %90 : vector<8x128xi1>, vector<8x128xi32>
    %cst_30 = arith.constant 0x7F800000 : f32
    %115 = vector.broadcast %cst_30 : f32 to vector<8x16xf32>
    %116 = arith.select %102, %115, %92 : vector<8x16xi1>, vector<8x16xf32>
    %cst_31 = arith.constant dense<0x7F800000> : vector<8xf32>
    %117 = vector.multi_reduction <minimumf>, %116, %cst_31 [1] : vector<8x16xf32> to vector<8xf32>
    %118 = vector.shape_cast %117 : vector<8xf32> to vector<8x1xf32>
    %119 = vector.broadcast %118 : vector<8x1xf32> to vector<8x16xf32>
    %120 = arith.cmpf oeq, %116, %119 : vector<8x16xf32>
    %c16_i32_32 = arith.constant 16 : i32
    %121 = vector.broadcast %c16_i32_32 : i32 to vector<8x16xi32>
    %122 = arith.select %120, %17, %121 : vector<8x16xi1>, vector<8x16xi32>
    %cst_33 = arith.constant dense<2147483647> : vector<8xi32>
    %123 = vector.multi_reduction <minsi>, %122, %cst_33 [1] : vector<8x16xi32> to vector<8xi32>
    %124 = vector.shape_cast %123 : vector<8xi32> to vector<8x1xi32>
    %125 = vector.broadcast %124 : vector<8x1xi32> to vector<8x16xi32>
    %126 = arith.cmpi eq, %17, %125 : vector<8x16xi32>
    %127 = arith.extui %126 : vector<8x16xi1> to vector<8x16xi32>
    %128 = arith.sitofp %127 : vector<8x16xi32> to vector<8x16xf32>
    %c4_i32 = arith.constant 4 : i32
    %129 = vector.broadcast %c4_i32 : i32 to vector<8x128xi32>
    %130 = arith.cmpi eq, %18, %129 : vector<8x128xi32>
    %131 = vector.shape_cast %118 : vector<8x1xf32> to vector<8x1xf32>
    %132 = vector.broadcast %131 : vector<8x1xf32> to vector<8x128xf32>
    %133 = arith.select %130, %132, %109 : vector<8x128xi1>, vector<8x128xf32>
    %c4_i32_34 = arith.constant 4 : i32
    %134 = vector.broadcast %c4_i32_34 : i32 to vector<8x128xi32>
    %135 = arith.cmpi eq, %18, %134 : vector<8x128xi32>
    %136 = vector.shape_cast %124 : vector<8x1xi32> to vector<8x1xi32>
    %137 = vector.broadcast %136 : vector<8x1xi32> to vector<8x128xi32>
    %138 = arith.select %135, %137, %114 : vector<8x128xi1>, vector<8x128xi32>
    %139 = tpu.concatenate %32, %56, %80, %104, %128 in 0 : vector<8x16xf32>, vector<8x16xf32>, vector<8x16xf32>, vector<8x16xf32>, vector<8x16xf32> -> vector<40x16xf32>
    %cst_35 = arith.constant dense<0.000000e+00> : vector<40x160xf32>
    %140 = tpu.matmul %139, %3, %cst_35 {dimension_numbers = #tpu.dot_dimension_numbers<[1], [0], [0], [1], [0, 0, 1, 1], [], []>, precision = #tpu.contract_precision<fp32>} : vector<40x16xf32>, vector<16x160xf32>, vector<40x160xf32> -> vector<40x160xf32>
    %c0_36 = arith.constant 0 : index
    %c0_37 = arith.constant 0 : index
    %141 = vector.load %arg5[%c0_36, %c0_37] : memref<8x128xf32, #tpu.memory_space<vmem>>, vector<8x128xf32>
    tpu.vector_store %arg5[%c0_36, %c0_37], %133 {strides = array<i32>} : memref<8x128xf32, #tpu.memory_space<vmem>>, vector<8x128xf32>,
    %c0_38 = arith.constant 0 : index
    %c0_39 = arith.constant 0 : index
    %142 = vector.load %arg6[%c0_38, %c0_39] : memref<8x128xi32, #tpu.memory_space<vmem>>, vector<8x128xi32>
    tpu.vector_store %arg6[%c0_38, %c0_39], %138 {strides = array<i32>} : memref<8x128xi32, #tpu.memory_space<vmem>>, vector<8x128xi32>,
    %143 = vector.shape_cast %140 : vector<40x160xf32> to vector<5x8x160xf32>
    %c0_40 = arith.constant 0 : index
    %c0_41 = arith.constant 0 : index
    %c0_42 = arith.constant 0 : index
    %144 = vector.load %arg7[%c0_40, %c0_41, %c0_42] : memref<5x8x160xf32, #tpu.memory_space<vmem>>, vector<5x8x160xf32>
    tpu.vector_store %arg7[%c0_40, %c0_41, %c0_42], %143 {strides = array<i32>} : memref<5x8x160xf32, #tpu.memory_space<vmem>>, vector<5x8x160xf32>,
    return
  }
  func.func @transform_0(%arg0: i32) -> (i32, i32) {
    %c0_i32 = arith.constant 0 : i32
    %c0_i32_0 = arith.constant 0 : i32
    return %arg0, %c0_i32 : i32, i32
  }
  func.func @transform_1(%arg0: i32) -> (i32, i32) {
    %c0_i32 = arith.constant 0 : i32
    %c0_i32_0 = arith.constant 0 : i32
    %c0_i32_1 = arith.constant 0 : i32
    return %c0_i32, %c0_i32_0 : i32, i32
  }
  func.func @transform_2(%arg0: i32) -> (i32, i32) {
    %c0_i32 = arith.constant 0 : i32
    %c0_i32_0 = arith.constant 0 : i32
    %c0_i32_1 = arith.constant 0 : i32
    return %c0_i32, %c0_i32_0 : i32, i32
  }
  func.func @transform_3(%arg0: i32) -> (i32, i32) {
    %c0_i32 = arith.constant 0 : i32
    %c0_i32_0 = arith.constant 0 : i32
    %c0_i32_1 = arith.constant 0 : i32
    return %c0_i32, %c0_i32_0 : i32, i32
  }
  func.func @transform_4(%arg0: i32) -> (i32, i32) {
    %c0_i32 = arith.constant 0 : i32
    %c0_i32_0 = arith.constant 0 : i32
    return %arg0, %c0_i32 : i32, i32
  }
  func.func @transform_5(%arg0: i32) -> (i32, i32) {
    %c0_i32 = arith.constant 0 : i32
    %c0_i32_0 = arith.constant 0 : i32
    return %arg0, %c0_i32 : i32, i32
  }
  func.func @transform_6(%arg0: i32) -> (i32, i32, i32) {
    %c0_i32 = arith.constant 0 : i32
    %c0_i32_0 = arith.constant 0 : i32
    %c0_i32_1 = arith.constant 0 : i32
    return %c0_i32, %arg0, %c0_i32_0 : i32, i32, i32
  }
}

</mosaic_0001>

<bundles_post_ra>
// kernel: tpu_custom_call.1
= control target key start
LH: loop header
LB: loop body
LE: loop exit
PB: predicated region body
PF: predicated region fallthrough
CT: control target
= control target key end

     0   :  { %12 = vsyncpa [#allocation3], 0  ;;  %s1527_s0 = inlined_call_operand.hbm [shape: f32[8,32], index: 0, kind: input, shape index: {}]   ;;  %s1528_s1 = inlined_call_operand.hbm [shape: f32[16,32], index: 1, kind: input, shape index: {}]   ;;  %s1529_s2 = inlined_call_operand.vmem [shape: f32[1,16], index: 2, kind: input, shape index: {}]   ;;  %s1530_s3 = inlined_call_operand.hbm [shape: f32[16,160], index: 3, kind: input, shape index: {}]   ;;  %s1531_s4 = inlined_call_operand.hbm [shape: f32[8,128], index: 4, kind: output, shape index: {0}]   ;;  %s1532_s5 = inlined_call_operand.hbm [shape: s32[8,128], index: 5, kind: output, shape index: {1}]   ;;  %s1533_s6 = inlined_call_operand.hbm [shape: f32[5,8,160], index: 6, kind: output, shape index: {2}]  }
   0x1   :  { %13 = vsyncpa [#allocation6], 0 }
   0x2   :  { %14 = vsyncpa [#allocation4], 0  ;;  %s31_s23 = sshll.u32 %s1528_s1, 4  ;;  %s32_s23 = int_to_ptr.hbm [resolvable:$true] %s31_s23 }
   0x3   :  { %15 = vsyncpa [#allocation10], 0  ;;  %s1247_s24 = smov [#allocation5]   ;;  %s21_s28 = sshll.u32 %s1527_s0, 4  ;;  %s22_s28 = int_to_ptr.hbm [resolvable:$true] %s21_s28 }
   0x4   :  { %s33_s25 = sshll.u32 %s1247_s24, 4  ;;  %s1248_s29 = smov 128   ;;  %s34_s25 = int_to_ptr.vmem [resolvable:$true] %s33_s25 }
   0x5   :  { %s1249_s30 = smov 8   ;;  %s1250_s7 = smov [#allocation2]  }
   0x6   :  { %39 = dma.hbm_to_vmem [thread:$0]  %s32_s23, 256, %s34_s25, [#allocation6], %s1248_s29, %s1248_s29, %s1249_s30  }
   0x7   :  { %s23_s8 = sshll.u32 %s1250_s7, 4  ;;  %s46_s11 = sshll.u32 %s1530_s3, 4  ;;  %s24_s8 = int_to_ptr.vmem [resolvable:$true] %s23_s8  ;;  %s47_s11 = int_to_ptr.hbm [resolvable:$true] %s46_s11 }
   0x8   :  { %26 = dma.hbm_to_vmem [thread:$0]  %s22_s28, 128, %s24_s8, [#allocation3]  }
   0x9   :  { %s1251_s1 = smov [#allocation7]   ;;  %s1252_s13 = smov 256  }
   0xa   :  { %s48_s12 = sshll.u32 %s1251_s1, 4  ;;  %s1253_s14 = smov 16   ;;  %s49_s12 = int_to_ptr.vmem [resolvable:$true] %s48_s12 }
   0xb   :  { %54 = dma.hbm_to_vmem [thread:$0]  %s47_s11, 512, %s49_s12, [#allocation6], %s1252_s13, %s1252_s13, %s1253_s14  }
   0xc   :  { %1239 = dma.done.wait [#allocation3], 128  }
   0xd   :  { %1240 = vsyncadd [#allocation3], 4294967168 }
   0xe   :  { %1241 = dma.done.wait [#allocation6], 768  }
   0xf   :  { %1242 = vsyncadd [#allocation6], 4294966528  ;;  %vm75_vm0 = vcmask 261120   ;;  %v67_v0 = vld [vmem:[#allocation2] sm:$0xff]  ;;  %v69_v1 = vld [vmem:[#allocation5 + $0x8] sm:$0xff]  ;;  %vm267_vm4 = vcmask 130048   ;;  %v265_v48 = vlaneseq }
  0x10   :  { %v68_v2 = vld [vmem:[#allocation5] sm:$0xff]  ;;  %v244_v3 = vmul.f32 %v67_v0, %v67_v0  ;;  %v77_v4 = vsel %vm75_vm0, %v67_v0, 0  ;;  %v83_v5 = vsel %vm75_vm0, %v69_v1, 0  ;;  %v1092_v43 = vld [vmem:[%s1529_s2] ss:$0 sm:$0xff]  ;;  %v71_v61 = vld [vmem:[#allocation7] sm:$0xff] }
  0x11   :  { %v80_v6 = vsel %vm75_vm0, %v68_v2, 0  ;;  %v103_v7 = vand.u32 4294901760, %v77_v4  ;;  %v99_v8 = vand.u32 4294901760, %v83_v5  ;;  %v1313_v49 = vand.u32 127, %v265_v48  ;;  %v73_v59 = vld [vmem:[#allocation7 + $0x10] sm:$0xff]  ;;  %s1255_s2 = smov [#allocation9]  }
  0x12   :  { %v101_v9 = vand.u32 4294901760, %v80_v6  ;;  %v245_v10 = vsel %vm75_vm0, %v244_v3, 0.0  ;;  %v431_v60 = vand.u32 4294901760, %v73_v59  ;;  %v433_v63 = vand.u32 4294901760, %v71_v61  ;;  %s1011_s15 = sshll.u32 %s1255_s2, 4  ;;  %s1013_s18 = sshll.u32 %s1532_s5, 4  ;;  %s1012_s15 = int_to_ptr.vmem [resolvable:$true] %s1011_s15  ;;  %s1014_s18 = int_to_ptr.hbm [resolvable:$true] %s1013_s18 }
  0x13   :  { %246 = vadd.xlane.f32.xlu0 %v245_v10  ;;  %v127_v11 = vsub.f32 %v83_v5, %v99_v8  ;;  %100 = vmatpush.xpose.msra.mxu0 %v99_v8  ;;  %v104_v13 = vsub.f32 %v77_v4, %v103_v7  ;;  %vm291_vm10 = vcmp.eq.s32.totalorder %v1313_v49, 0  ;;  %vm318_vm11 = vcmp.eq.s32.totalorder %v1313_v49, 1  ;;  %s1002_s21 = sshll.u32 %s1531_s4, 4  ;;  %s1256_s22 = smov [#allocation8]   ;;  %s1003_s21 = int_to_ptr.hbm [resolvable:$true] %s1002_s21 }
  0x14   :  { %v133_v12 = vsub.f32 %v80_v6, %v101_v9  ;;  %184 = vmatpush.xpose.msra.mxu3 %v99_v8  ;;  %v491_v62 = vsub.f32 %v73_v59, %v431_v60  ;;  %v497_v1 = vsub.f32 %v71_v61, %v433_v63  ;;  %vm345_vm15 = vcmp.eq.s32.totalorder %v1313_v49, 2  ;;  %s1000_s23 = sshll.u32 %s1256_s22, 4  ;;  %s1257_s4 = smov [#allocation11]   ;;  %s1001_s23 = int_to_ptr.vmem [resolvable:$true] %s1000_s23 }
  0x15   :  { %159 = vmatpush.xpose.msra.mxu2 %v127_v11  ;;  %v128_v14 = vand.u32 4294901760, %v127_v11  ;;  %v105_v16 = vand.u32 4294901760, %v104_v13  ;;  %s1021_s5 = sshll.u32 %s1257_s4, 4  ;;  %s1023_s26 = sshll.u32 %s1533_s6, 4  ;;  %s1022_s5 = int_to_ptr.vmem [resolvable:$true] %s1021_s5  ;;  %s1024_s26 = int_to_ptr.hbm [resolvable:$true] %s1023_s26 }
  0x16   :  { %v134_v15 = vand.u32 4294901760, %v133_v12  ;;  %v492_v0 = vand.u32 4294901760, %v491_v62  ;;  %v498_v3 = vand.u32 4294901760, %v497_v1 }
  0x17   :  { %v129_v17 = vsub.f32 %v127_v11, %v128_v14  ;;  %102 = vmatpush.xpose.msra.mxu0 %v101_v9  ;;  %v106_v19 = vsub.f32 %v104_v13, %v105_v16 }
  0x18   :  { %v135_v18 = vsub.f32 %v133_v12, %v134_v15  ;;  %186 = vmatpush.xpose.msra.mxu3 %v101_v9  ;;  %v493_v2 = vsub.f32 %v491_v62, %v492_v0  ;;  %v499_v5 = vsub.f32 %v497_v1, %v498_v3 }
  0x19   :  { %v130_v20 = vand.u32 4294901760, %v129_v17  ;;  %162 = vmatpush.xpose.msra.mxu2 %v133_v12  ;;  %v107_v21 = vand.u32 4294901760, %v106_v19  ;;  %v1254_v12 = vmov 0.0  }
  0x1a   :  { %v136_v22 = vand.u32 4294901760, %v135_v18  ;;  %v494_v4 = vand.u32 4294901760, %v493_v2  ;;  %v500_v6 = vand.u32 4294901760, %v499_v5 }
  0x1b   :  { %211 = vmatpush.xpose.msrb.mxu0 %v128_v14  ;;  %131 = vmatpush.xpose.msra.mxu1 %v130_v20 }
  0x1c   :  { %108 = vmatmul.f32.vlgmr.msra.gmra.mxu0 %v107_v21  ;;  %165 = vmatmul.f32.vlgmr.msra.gmra.mxu2 %v104_v13 }
  0x1d   :  { %190 = vmatmul.f32.vlgmr.msra.gmra.mxu3 %v105_v16  ;;  %432 = vmatpush.msrb.mxu2 %v431_v60 }
  0x1e   :  { %495 = vmatpush.msrb.mxu3 %v494_v4 }
  0x1f   :  { %215 = vmatpush.xpose.msrb.mxu0 %v134_v15  ;;  %137 = vmatpush.xpose.msra.mxu1 %v136_v22 }
  0x20   :  { %434 = vmatpush.msrb.mxu2 %v433_v63  ;;  %501 = vmatpush.msrb.mxu3 %v500_v6 }
  0x22   :  { %139 = vmatmul.f32.vlgmr.msra.gmra.mxu1 %v103_v7  ;;  %635 = vmatpush.msra.mxu2 %v492_v0 }
  0x23   :  { %236 = vmatpush.xpose.msrb.mxu1 %v99_v8  ;;  %539 = vmatpush.msra.mxu0 %v491_v62 }
  0x24   :  { %217 = vmatmul.f32.vlgmr.msrb.gmra.mxu0 %v103_v7  ;;  %639 = vmatpush.msra.mxu2 %v498_v3 }
  0x25   :  { %542 = vmatpush.msra.mxu0 %v497_v1  ;;  %676 = vmatpush.msra.mxu3 %v431_v60 }
  0x27   :  { %238 = vmatpush.xpose.msrb.mxu1 %v101_v9  ;;  %678 = vmatpush.msra.mxu3 %v433_v63 }
  0x2a   :  { %240 = vmatmul.f32.vlgmr.msrb.gmra.mxu1 %v103_v7 }
  0x2b   :  { %584 = vmatpush.msra.mxu1 %v431_v60 }
  0x2d   :  { %586 = vmatpush.msra.mxu1 %v433_v63 }
  0x86   :  { %v247_v23 = vpop.xlane.xlu0 %246 }
  0x87   :  { %1093 = vrsqrt.f32 %v247_v23  ;;  %vm254_vm1 = vweird.f32 %v247_v23 }
  0x8d   :  { %v1094_v24 = vpop.eup %1093 }
  0x8e   :  { %v249_v25 = vmul.f32 %v1094_v24, %v247_v23  ;;  %vm255_vm2 = vweird.f32 %v1094_v24 }
  0x8f   :  { %vm256_vm3 = vmor %vm254_vm1, %vm255_vm2 }
  0x90   :  { %v250_v26 = vmul.f32 %v1094_v24, %v249_v25 }
  0x92   :  { %v251_v27 = vmul.f32 0.5, %v250_v26 }
  0x94   :  { %v252_v29 = vsub.f32 1.5, %v251_v27 }
  0x96   :  { %v253_v33 = vmul.f32 %v1094_v24, %v252_v29 }
  0x98   :  { %v257_v38 = vsel %vm256_vm3, %v1094_v24, %v253_v33 }
  0x99   :  { %v109_v28 = vpop.f32.mrf.mxu0  ;;  %v258_v42 = vmin.f32 %v257_v38, 1e+08 }
  0x9f   :  { %v140_v30 = vpop.f32.mrf.mxu1  ;;  %v166_v31 = vpop.f32.mrf.mxu2 }
  0xa0   :  { %v141_v32 = vadd.f32 %v140_v30, %v109_v28  ;;  %v191_v34 = vpop.f32.mrf.mxu3 }
  0xa1   :  { %v218_v36 = vpop.f32.mrf.mxu0 }
  0xa2   :  { %v167_v35 = vadd.f32 %v166_v31, %v141_v32 }
  0xa4   :  { %v192_v37 = vadd.f32 %v191_v34, %v167_v35 }
  0xa6   :  { %v219_v39 = vadd.f32 %v218_v36, %v192_v37 }
  0xa7   :  { %v241_v40 = vpop.f32.mrf.mxu1 }
  0xa8   :  { %v242_v41 = vadd.f32 %v241_v40, %v219_v39 }
  0xaa   :  { %v259_v44 = vmul.f32 %v258_v42, %v242_v41 }
  0xac   :  { %v263_v45 = vmul.f32 %v1092_v43, %v259_v44 }
  0xae   :  { %v264_v46 = vsub.f32 1.0, %v263_v45 }
  0xb0   :  { %v268_v47 = vsel %vm267_vm4, %v264_v46, inf }
  0xb1   :  { %269 = vmin.xlane.f32.xlu0 %v268_v47 }
 0x124   :  { %v1315_v50 = vpop.xlane.xlu0 %269 }
 0x125   :  { %vm271_vm5 = vcmp.eq.f32.partialorder %v264_v46, %v1315_v50 }
 0x126   :  { %v272_v51 = vsel %vm271_vm5, %v1313_v49, 16  ;;  %vm372_vm5 = vcmp.eq.s32.totalorder %v1313_v49, 3 }
 0x127   :  { %v273_v52 = vsel %vm267_vm4, %v272_v51, 2147483647 }
 0x128   :  { %v275_v53 = vshra.s32 %v273_v52, 16  ;;  %v274_v55 = vand.u32 65535, %v273_v52 }
 0x12a   :  { %v277_v54 = vcvt.s32.f32 %v275_v53  ;;  %v276_v57 = vcvt.s32.f32 %v274_v55 }
 0x12c   :  { %278 = vmin.xlane.f32.xlu1 %v277_v54 }
 0x19f   :  { %v279_v56 = vpop.xlane.xlu1 %278 }
 0x1a0   :  { %vm280_vm6 = vcmp.eq.f32.partialorder %v277_v54, %v279_v56  ;;  %v285_v7 = vcvt.f32.s32 %v279_v56 }
 0x1a1   :  { %v281_v58 = vsel %vm280_vm6, %v276_v57, inf }
 0x1a2   :  { %282 = vmin.xlane.f32.xlu1 %v281_v58  ;;  %v286_v9 = vshll.u32 %v285_v7, 16 }
 0x215   :  { %v283_v8 = vpop.xlane.xlu1 %282 }
 0x216   :  { %v284_v10 = vcvt.f32.s32 %v283_v8 }
 0x218   :  { %v287_v11 = vadd.s32 %v286_v9, %v284_v10 }
 0x21a   :  { %vm288_vm7 = vcmp.eq.s32.totalorder %v1313_v49, %v287_v11  ;;  %v293_v35 = vsel %vm291_vm10, %v287_v11, 0 }
 0x21b   :  { %v1322_v13 = vsel %vm288_vm7, 1.0, %v1254_v12  ;;  %v294_v14 = vsel %vm288_vm7, inf, %v264_v46  ;;  %vm399_vm7 = vcmp.eq.s32.totalorder %v1313_v49, 4 }
 0x21c   :  { %1051 = vmatmul.msk.f32.vlgmr.msrb.gmra.mxu3 %vm267_vm4, %v1322_v13  ;;  %v295_v15 = vsel %vm267_vm4, %v294_v14, inf  ;;  %v403_v16 = vsel %vm267_vm4, %v1322_v13, 0 }
 0x21d   :  { %296 = vmin.xlane.f32.xlu2 %v295_v15  ;;  %v1329_v17 = vsub.f32 %v403_v16, %v403_v16 }
 0x21f   :  { %545 = vmatmul.f32.vlgmr.msra.gmra.mxu0 %v1329_v17  ;;  %v1333_v18 = vand.u32 4294901760, %v1329_v17 }
 0x221   :  { %590 = vmatmul.f32.vlgmr.msra.gmra.mxu1 %v1333_v18  ;;  %v438_v19 = vsub.f32 %v1329_v17, %v1333_v18 }
 0x223   :  { %v1338_v20 = vand.u32 4294901760, %v438_v19 }
 0x225   :  { %440 = vmatmul.f32.vlgmr.msrb.gmra.mxu2 %v1338_v20 }
 0x290   :  { %v1341_v21 = vpop.xlane.xlu2 %296 }
 0x291   :  { %vm298_vm8 = vcmp.eq.f32.partialorder %v294_v14, %v1341_v21 }
 0x292   :  { %v299_v22 = vsel %vm298_vm8, %v1313_v49, 16 }
 0x293   :  { %v300_v23 = vsel %vm267_vm4, %v299_v22, 2147483647 }
 0x294   :  { %v302_v24 = vshra.s32 %v300_v23, 16  ;;  %v301_v26 = vand.u32 65535, %v300_v23 }
 0x296   :  { %v304_v25 = vcvt.s32.f32 %v302_v24  ;;  %v303_v28 = vcvt.s32.f32 %v301_v26 }
 0x298   :  { %305 = vmin.xlane.f32.xlu2 %v304_v25 }
 0x30b   :  { %v306_v27 = vpop.xlane.xlu2 %305 }
 0x30c   :  { %vm307_vm9 = vcmp.eq.f32.partialorder %v304_v25, %v306_v27  ;;  %v312_v30 = vcvt.f32.s32 %v306_v27 }
 0x30d   :  { %v308_v29 = vsel %vm307_vm9, %v303_v28, inf }
 0x30e   :  { %309 = vmin.xlane.f32.xlu0 %v308_v29  ;;  %v313_v32 = vshll.u32 %v312_v30, 16 }
 0x381   :  { %v310_v31 = vpop.xlane.xlu0 %309 }
 0x382   :  { %v311_v33 = vcvt.f32.s32 %v310_v31 }
 0x384   :  { %v314_v34 = vadd.s32 %v313_v32, %v311_v33 }
 0x386   :  { %vm315_vm12 = vcmp.eq.s32.totalorder %v1313_v49, %v314_v34  ;;  %v320_v36 = vsel %vm318_vm11, %v314_v34, %v293_v35  ;;  %v292_v35 = vsel %vm291_vm10, %v1315_v50, 0.0 }
 0x387   :  { %v1354_v37 = vsel %vm315_vm12, 1.0, %v1254_v12  ;;  %v321_v38 = vsel %vm315_vm12, inf, %v294_v14 }
 0x388   :  { %1052 = vmatmul.msk.f32.gmra.mxu3 %vm267_vm4, %v1354_v37  ;;  %v322_v39 = vsel %vm267_vm4, %v321_v38, inf  ;;  %v406_v40 = vsel %vm267_vm4, %v1354_v37, 0 }
 0x389   :  { %323 = vmin.xlane.f32.xlu1 %v322_v39  ;;  %v1361_v41 = vsub.f32 %v406_v40, %v406_v40 }
 0x38b   :  { %550 = vmatmul.f32.gmra.mxu0 %v1361_v41  ;;  %v1365_v42 = vand.u32 4294901760, %v1361_v41 }
 0x38d   :  { %596 = vmatmul.f32.gmra.mxu1 %v1365_v42  ;;  %v446_v43 = vsub.f32 %v1361_v41, %v1365_v42 }
 0x38f   :  { %v1370_v44 = vand.u32 4294901760, %v446_v43 }
 0x391   :  { %448 = vmatmul.f32.gmra.mxu2 %v1370_v44 }
 0x3fc   :  { %v1373_v45 = vpop.xlane.xlu1 %323 }
 0x3fd   :  { %vm325_vm13 = vcmp.eq.f32.partialorder %v321_v38, %v1373_v45 }
 0x3fe   :  { %v326_v46 = vsel %vm325_vm13, %v1313_v49, 16 }
 0x3ff   :  { %v327_v47 = vsel %vm267_vm4, %v326_v46, 2147483647 }
 0x400   :  { %v329_v48 = vshra.s32 %v327_v47, 16  ;;  %v328_v52 = vand.u32 65535, %v327_v47 }
 0x402   :  { %v331_v51 = vcvt.s32.f32 %v329_v48  ;;  %v330_v54 = vcvt.s32.f32 %v328_v52  ;;  %v74_v48 = vld [vmem:[#allocation7 + $0x18] sm:$0xff] }
 0x404   :  { %332 = vmin.xlane.f32.xlu2 %v331_v51 }
 0x477   :  { %v333_v53 = vpop.xlane.xlu2 %332 }
 0x478   :  { %vm334_vm14 = vcmp.eq.f32.partialorder %v331_v51, %v333_v53  ;;  %v339_v56 = vcvt.f32.s32 %v333_v53  ;;  %v714_v51 = vand.u32 4294901760, %v74_v48 }
 0x479   :  { %v335_v55 = vsel %vm334_vm14, %v330_v54, inf }
 0x47a   :  { %336 = vmin.xlane.f32.xlu0 %v335_v55  ;;  %v340_v58 = vshll.u32 %v339_v56, 16  ;;  %715 = vmatpush.msrb.mxu0 %v714_v51 }
 0x47b   :  { %867 = vmatpush.msrb.mxu3 %v714_v51 }
 0x4ed   :  { %v337_v57 = vpop.xlane.xlu0 %336 }
 0x4ee   :  { %v338_v59 = vcvt.f32.s32 %v337_v57 }
 0x4f0   :  { %v341_v60 = vadd.s32 %v340_v58, %v338_v59  ;;  %v72_v59 = vld [vmem:[#allocation7 + $0x8] sm:$0xff] }
 0x4f2   :  { %vm342_vm1 = vcmp.eq.s32.totalorder %v1313_v49, %v341_v60  ;;  %v347_v61 = vsel %vm345_vm15, %v341_v60, %v320_v36  ;;  %v319_v36 = vsel %vm318_vm11, %v1341_v21, %v292_v35  ;;  %v716_v60 = vand.u32 4294901760, %v72_v59 }
 0x4f3   :  { %v1383_v62 = vsel %vm342_vm1, 1.0, %v1254_v12  ;;  %v348_v63 = vsel %vm342_vm1, inf, %v321_v38  ;;  %v346_v38 = vsel %vm345_vm15, %v1373_v45, %v319_v36  ;;  %v774_v45 = vsub.f32 %v74_v48, %v714_v51 }
 0x4f4   :  { %1053 = vmatmul.msk.f32.gmra.mxu3 %vm267_vm4, %v1383_v62  ;;  %v349_v0 = vsel %vm267_vm4, %v348_v63, inf  ;;  %v409_v1 = vsel %vm267_vm4, %v1383_v62, 0  ;;  %717 = vmatpush.msrb.mxu0 %v716_v60 }
 0x4f5   :  { %350 = vmin.xlane.f32.xlu1 %v349_v0  ;;  %v1390_v2 = vsub.f32 %v409_v1, %v409_v1  ;;  %v775_v52 = vand.u32 4294901760, %v774_v45  ;;  %822 = vmatpush.msrb.mxu2 %v774_v45 }
 0x4f6   :  { %869 = vmatpush.msrb.mxu3 %v716_v60 }
 0x4f7   :  { %555 = vmatmul.f32.gmra.mxu0 %v1390_v2  ;;  %v1394_v3 = vand.u32 4294901760, %v1390_v2  ;;  %v776_v53 = vsub.f32 %v774_v45, %v775_v52 }
 0x4f8   :  { %918 = vmatpush.msra.mxu0 %v775_v52 }
 0x4f9   :  { %602 = vmatmul.f32.gmra.mxu1 %v1394_v3  ;;  %v454_v4 = vsub.f32 %v1390_v2, %v1394_v3  ;;  %v777_v54 = vand.u32 4294901760, %v776_v53 }
 0x4fb   :  { %v1399_v5 = vand.u32 4294901760, %v454_v4  ;;  %778 = vmatpush.msrb.mxu1 %v777_v54 }
 0x4fd   :  { %456 = vmatmul.f32.gmra.mxu2 %v1399_v5 }
 0x568   :  { %v351_v6 = vpop.xlane.xlu1 %350 }
 0x569   :  { %vm352_vm2 = vcmp.eq.f32.partialorder %v348_v63, %v351_v6  ;;  %v373_v39 = vsel %vm372_vm5, %v351_v6, %v346_v38 }
 0x56a   :  { %v353_v7 = vsel %vm352_vm2, %v1313_v49, 16 }
 0x56b   :  { %v354_v8 = vsel %vm267_vm4, %v353_v7, 2147483647 }
 0x56c   :  { %v356_v9 = vshra.s32 %v354_v8, 16  ;;  %v355_v11 = vand.u32 65535, %v354_v8 }
 0x56e   :  { %v358_v10 = vcvt.s32.f32 %v356_v9  ;;  %v357_v15 = vcvt.s32.f32 %v355_v11 }
 0x570   :  { %359 = vmin.xlane.f32.xlu2 %v358_v10 }
 0x5e3   :  { %v360_v14 = vpop.xlane.xlu2 %359 }
 0x5e4   :  { %vm361_vm3 = vcmp.eq.f32.partialorder %v358_v10, %v360_v14  ;;  %v366_v19 = vcvt.f32.s32 %v360_v14 }
 0x5e5   :  { %v362_v16 = vsel %vm361_vm3, %v357_v15, inf }
 0x5e6   :  { %363 = vmin.xlane.f32.xlu0 %v362_v16  ;;  %v367_v23 = vshll.u32 %v366_v19, 16 }
 0x659   :  { %v364_v22 = vpop.xlane.xlu0 %363 }
 0x65a   :  { %v365_v24 = vcvt.f32.s32 %v364_v22 }
 0x65c   :  { %v368_v25 = vadd.s32 %v367_v23, %v365_v24 }
 0x65e   :  { %vm369_vm6 = vcmp.eq.s32.totalorder %v1313_v49, %v368_v25  ;;  %v1408_v26 = vsel %vm372_vm5, %v368_v25, %v347_v61  ;;  %v780_v61 = vsub.f32 %v72_v59, %v716_v60 }
 0x65f   :  { %v1411_v27 = vsel %vm369_vm6, 1.0, %v1254_v12  ;;  %v375_v28 = vsel %vm369_vm6, inf, %v348_v63 }
 0x660   :  { %1054 = vmatmul.msk.f32.gmra.mxu3 %vm267_vm4, %v1411_v27  ;;  %v376_v29 = vsel %vm267_vm4, %v375_v28, inf  ;;  %v412_v30 = vsel %vm267_vm4, %v1411_v27, 0  ;;  %v781_v63 = vand.u32 4294901760, %v780_v61  ;;  %825 = vmatpush.msrb.mxu2 %v780_v61 }
 0x661   :  { %377 = vmin.xlane.f32.xlu1 %v376_v29  ;;  %v1418_v31 = vsub.f32 %v412_v30, %v412_v30 }
 0x662   :  { %v782_v0 = vsub.f32 %v780_v61, %v781_v63  ;;  %922 = vmatpush.msra.mxu0 %v781_v63 }
 0x663   :  { %560 = vmatmul.f32.gmra.mxu0 %v1418_v31  ;;  %v1422_v32 = vand.u32 4294901760, %v1418_v31 }
 0x664   :  { %v783_v1 = vand.u32 4294901760, %v782_v0 }
 0x665   :  { %608 = vmatmul.f32.gmra.mxu1 %v1422_v32  ;;  %v462_v33 = vsub.f32 %v1418_v31, %v1422_v32 }
 0x666   :  { %784 = vmatpush.msrb.mxu1 %v783_v1 }
 0x667   :  { %v1427_v34 = vand.u32 4294901760, %v462_v33 }
 0x668   :  { %959 = vmatpush.msra.mxu1 %v714_v51 }
 0x669   :  { %464 = vmatmul.f32.gmra.mxu2 %v1427_v34 }
 0x66a   :  { %961 = vmatpush.msra.mxu1 %v716_v60 }
 0x6d4   :  { %v378_v40 = vpop.xlane.xlu1 %377 }
 0x6d5   :  { %vm379_vm8 = vcmp.eq.f32.partialorder %v375_v28, %v378_v40  ;;  %v400_v43 = vsel %vm399_vm7, %v378_v40, %v373_v39 }
 0x6d6   :  { %v380_v50 = vsel %vm379_vm8, %v1313_v49, 16  ;;  %983 = vst [vmem:[#allocation8] sm:$0xff] %v400_v43 }
 0x6d7   :  { %v381_v46 = vsel %vm267_vm4, %v380_v50, 2147483647  ;;  %1005 = dma.vmem_to_hbm [thread:$0]  %s1001_s23, 128, %s1003_s21, [#allocation4]  }
 0x6d8   :  { %v383_v21 = vshra.s32 %v381_v46, 16  ;;  %v382_v55 = vand.u32 65535, %v381_v46 }
 0x6da   :  { %v385_v47 = vcvt.s32.f32 %v383_v21  ;;  %v384_v57 = vcvt.s32.f32 %v382_v55 }
 0x6dc   :  { %386 = vmin.xlane.f32.xlu2 %v385_v47 }
 0x74f   :  { %v387_v56 = vpop.xlane.xlu2 %386 }
 0x750   :  { %vm388_vm9 = vcmp.eq.f32.partialorder %v385_v47, %v387_v56  ;;  %v393_v4 = vcvt.f32.s32 %v387_v56 }
 0x751   :  { %v389_v58 = vsel %vm388_vm9, %v384_v57, inf }
 0x752   :  { %390 = vmin.xlane.f32.xlu0 %v389_v58  ;;  %v394_v7 = vshll.u32 %v393_v4, 16 }
 0x7c5   :  { %v391_v6 = vpop.xlane.xlu0 %390 }
 0x7c6   :  { %v392_v8 = vcvt.f32.s32 %v391_v6 }
 0x7c8   :  { %v395_v9 = vadd.s32 %v394_v7, %v392_v8 }
 0x7ca   :  { %vm396_vm10 = vcmp.eq.s32.totalorder %v1313_v49, %v395_v9  ;;  %v401_v10 = vsel %vm399_vm7, %v395_v9, %v1408_v26  ;;  %v546_v49 = vpop.f32.mrf.mxu0 }
 0x7cb   :  { %v1050_v11 = vsel %vm396_vm10, 1.0, %v1254_v12  ;;  %984 = vst [vmem:[#allocation9] sm:$0xff] %v401_v10  ;;  %v591_v12 = vpop.f32.mrf.mxu1 }
 0x7cc   :  { %1055 = vmatmul.msk.f32.gmra.mxu3 %vm267_vm4, %v1050_v11  ;;  %v415_v14 = vsel %vm267_vm4, %v1050_v11, 0  ;;  %1016 = dma.vmem_to_hbm [thread:$0]  %s1012_s15, 128, %s1014_s18, [#allocation10]  }
 0x7cd   :  { %v468_v15 = vsub.f32 %v415_v14, %v415_v14 }
 0x7cf   :  { %565 = vmatmul.f32.gmra.mxu0 %v468_v15  ;;  %v469_v16 = vand.u32 4294901760, %v468_v15 }
 0x7d1   :  { %614 = vmatmul.f32.gmra.mxu1 %v469_v16  ;;  %v470_v19 = vsub.f32 %v468_v15, %v469_v16 }
 0x7d3   :  { %v471_v22 = vand.u32 4294901760, %v470_v19 }
 0x7d4   :  { %1061 = vmatmul.msk.f32.vlgmr.msra.gmra.mxu3 %vm267_vm4, %v1322_v13 }
 0x7d5   :  { %472 = vmatmul.f32.gmra.mxu2 %v471_v22 }
 0x7d7   :  { %723 = vmatmul.f32.vlgmr.msrb.gmra.mxu0 %v1338_v20 }
 0x7d9   :  { %1066 = vmatmul.msk.f32.vlgmr.msrb.gmra.mxu1 %vm267_vm4, %v1322_v13 }
 0x7dc   :  { %1062 = vmatmul.msk.f32.gmra.mxu3 %vm267_vm4, %v1354_v37 }
 0x7dd   :  { %1056 = vmatmul.msk.f32.vlgmr.msra.gmra.mxu2 %vm267_vm4, %v1322_v13 }
 0x7df   :  { %731 = vmatmul.f32.gmra.mxu0 %v1370_v44 }
 0x7e1   :  { %1067 = vmatmul.msk.f32.gmra.mxu1 %vm267_vm4, %v1354_v37 }
 0x7e4   :  { %1063 = vmatmul.msk.f32.gmra.mxu3 %vm267_vm4, %v1383_v62 }
 0x7e5   :  { %1057 = vmatmul.msk.f32.gmra.mxu2 %vm267_vm4, %v1354_v37 }
 0x7e7   :  { %739 = vmatmul.f32.gmra.mxu0 %v1399_v5 }
 0x7e9   :  { %1068 = vmatmul.msk.f32.gmra.mxu1 %vm267_vm4, %v1383_v62 }
 0x7ec   :  { %1064 = vmatmul.msk.f32.gmra.mxu3 %vm267_vm4, %v1411_v27 }
 0x7ed   :  { %1058 = vmatmul.msk.f32.gmra.mxu2 %vm267_vm4, %v1383_v62 }
 0x7ef   :  { %747 = vmatmul.f32.gmra.mxu0 %v1427_v34 }
 0x7f1   :  { %1069 = vmatmul.msk.f32.gmra.mxu1 %vm267_vm4, %v1411_v27 }
 0x7f4   :  { %1065 = vmatmul.msk.f32.gmra.mxu3 %vm267_vm4, %v1050_v11 }
 0x7f5   :  { %1059 = vmatmul.msk.f32.gmra.mxu2 %vm267_vm4, %v1411_v27 }
 0x7f7   :  { %755 = vmatmul.f32.gmra.mxu0 %v471_v22 }
 0x7f9   :  { %1070 = vmatmul.msk.f32.gmra.mxu1 %vm267_vm4, %v1050_v11 }
 0x7fc   :  { %873 = vmatmul.f32.vlgmr.msrb.gmra.mxu3 %v1333_v18  ;;  %v597_v18 = vpop.f32.mrf.mxu1 }
 0x7fd   :  { %1060 = vmatmul.msk.f32.gmra.mxu2 %vm267_vm4, %v1050_v11 }
 0x7ff   :  { %1071 = vmatmul.msk.f32.vlgmr.msra.gmra.mxu0 %vm267_vm4, %v1322_v13 }
 0x801   :  { %1076 = vmatmul.msk.f32.vlgmr.msra.gmra.mxu1 %vm267_vm4, %v1322_v13  ;;  %v504_v13 = vpop.f32.mrf.mxu3 }
 0x804   :  { %879 = vmatmul.f32.gmra.mxu3 %v1365_v42  ;;  %v603_v42 = vpop.f32.mrf.mxu1 }
 0x805   :  { %828 = vmatmul.f32.vlgmr.msrb.gmra.mxu2 %v1329_v17  ;;  %v551_v17 = vpop.f32.mrf.mxu0 }
 0x807   :  { %1072 = vmatmul.msk.f32.gmra.mxu0 %vm267_vm4, %v1354_v37 }
 0x809   :  { %1077 = vmatmul.msk.f32.gmra.mxu1 %vm267_vm4, %v1354_v37  ;;  %v508_v20 = vpop.f32.mrf.mxu3  ;;  %v441_v37 = vpop.f32.mrf.mxu2 }
 0x80a   :  { %v505_v30 = vadd.f32 %v504_v13, %v441_v37 }
 0x80c   :  { %885 = vmatmul.f32.gmra.mxu3 %v1394_v3  ;;  %v609_v3 = vpop.f32.mrf.mxu1  ;;  %v547_v33 = vadd.f32 %v546_v49, %v505_v30 }
 0x80d   :  { %833 = vmatmul.f32.gmra.mxu2 %v1361_v41  ;;  %v556_v41 = vpop.f32.mrf.mxu0 }
 0x80e   :  { %v592_v39 = vadd.f32 %v591_v12, %v547_v33 }
 0x80f   :  { %1073 = vmatmul.msk.f32.gmra.mxu0 %vm267_vm4, %v1383_v62 }
 0x811   :  { %1078 = vmatmul.msk.f32.gmra.mxu1 %vm267_vm4, %v1383_v62  ;;  %v512_v44 = vpop.f32.mrf.mxu3  ;;  %v449_v62 = vpop.f32.mrf.mxu2 }
 0x812   :  { %v509_v36 = vadd.f32 %v508_v20, %v449_v62 }
 0x814   :  { %891 = vmatmul.f32.gmra.mxu3 %v1422_v32  ;;  %v552_v50 = vadd.f32 %v551_v17, %v509_v36 }
 0x815   :  { %838 = vmatmul.f32.gmra.mxu2 %v1390_v2  ;;  %v561_v2 = vpop.f32.mrf.mxu0 }
 0x816   :  { %v598_v51 = vadd.f32 %v597_v18, %v552_v50 }
 0x817   :  { %1074 = vmatmul.msk.f32.gmra.mxu0 %vm267_vm4, %v1411_v27 }
 0x819   :  { %1079 = vmatmul.msk.f32.gmra.mxu1 %vm267_vm4, %v1411_v27  ;;  %v516_v5 = vpop.f32.mrf.mxu3  ;;  %v457_v23 = vpop.f32.mrf.mxu2 }
 0x81a   :  { %v513_v47 = vadd.f32 %v512_v44, %v457_v23 }
 0x81c   :  { %897 = vmatmul.f32.gmra.mxu3 %v469_v16  ;;  %v557_v54 = vadd.f32 %v556_v41, %v513_v47 }
 0x81d   :  { %843 = vmatmul.f32.gmra.mxu2 %v1418_v31 }
 0x81e   :  { %v604_v58 = vadd.f32 %v603_v42, %v557_v54 }
 0x81f   :  { %1075 = vmatmul.msk.f32.gmra.mxu0 %vm267_vm4, %v1050_v11 }
 0x821   :  { %1080 = vmatmul.msk.f32.gmra.mxu1 %vm267_vm4, %v1050_v11  ;;  %v465_v27 = vpop.f32.mrf.mxu2 }
 0x822   :  { %v517_v56 = vadd.f32 %v516_v5, %v465_v27 }
 0x824   :  { %v562_v0 = vadd.f32 %v561_v2, %v517_v56 }
 0x825   :  { %848 = vmatmul.f32.gmra.mxu2 %v468_v15 }
 0x826   :  { %v610_v6 = vadd.f32 %v609_v3, %v562_v0 }
 0x84c   :  { %v566_v24 = vpop.f32.mrf.mxu0 }
 0x84e   :  { %v615_v25 = vpop.f32.mrf.mxu1 }
 0x84f   :  { %v520_v26 = vpop.f32.mrf.mxu3 }
 0x854   :  { %v724_v28 = vpop.f32.mrf.mxu0 }
 0x856   :  { %v787_v29 = vpop.f32.mrf.mxu1 }
 0x857   :  { %v681_v31 = vpop.f32.mrf.mxu3  ;;  %v788_v18 = vadd.f32 %v787_v29, %v724_v28 }
 0x858   :  { %v473_v32 = vpop.f32.mrf.mxu2 }
 0x859   :  { %v521_v4 = vadd.f32 %v520_v26, %v473_v32 }
 0x85b   :  { %v567_v11 = vadd.f32 %v566_v24, %v521_v4 }
 0x85c   :  { %v732_v34 = vpop.f32.mrf.mxu0 }
 0x85d   :  { %v616_v16 = vadd.f32 %v615_v25, %v567_v11 }
 0x85e   :  { %v791_v35 = vpop.f32.mrf.mxu1 }
 0x85f   :  { %v685_v38 = vpop.f32.mrf.mxu3  ;;  %v792_v2 = vadd.f32 %v791_v35, %v732_v34 }
 0x860   :  { %v642_v40 = vpop.f32.mrf.mxu2 }
 0x861   :  { %v643_v43 = vadd.f32 %v642_v40, %v592_v39 }
 0x863   :  { %v682_v46 = vadd.f32 %v681_v31, %v643_v43 }
 0x864   :  { %v740_v21 = vpop.f32.mrf.mxu0 }
 0x865   :  { %985 = vst [vmem:[#allocation11] sm:$0xff] %v682_v46 }
 0x866   :  { %v795_v45 = vpop.f32.mrf.mxu1 }
 0x867   :  { %v689_v48 = vpop.f32.mrf.mxu3  ;;  %v796_v30 = vadd.f32 %v795_v45, %v740_v21 }
 0x868   :  { %v646_v52 = vpop.f32.mrf.mxu2 }
 0x869   :  { %v647_v53 = vadd.f32 %v646_v52, %v598_v51 }
 0x86b   :  { %v686_v55 = vadd.f32 %v685_v38, %v647_v53 }
 0x86c   :  { %v748_v59 = vpop.f32.mrf.mxu0 }
 0x86d   :  { %987 = vst [vmem:[#allocation11 + $0x10] sm:$0xff] %v686_v55 }
 0x86e   :  { %v799_v63 = vpop.f32.mrf.mxu1 }
 0x86f   :  { %v693_v57 = vpop.f32.mrf.mxu3  ;;  %v800_v34 = vadd.f32 %v799_v63, %v748_v59 }
 0x870   :  { %v650_v60 = vpop.f32.mrf.mxu2 }
 0x871   :  { %v651_v61 = vadd.f32 %v650_v60, %v604_v58 }
 0x873   :  { %v690_v1 = vadd.f32 %v689_v48, %v651_v61 }
 0x874   :  { %v756_v10 = vpop.f32.mrf.mxu0 }
 0x875   :  { %989 = vst [vmem:[#allocation11 + $0x20] sm:$0xff] %v690_v1 }
 0x876   :  { %v803_v15 = vpop.f32.mrf.mxu1 }
 0x877   :  { %v697_v7 = vpop.f32.mrf.mxu3  ;;  %v804_v48 = vadd.f32 %v803_v15, %v756_v10 }
 0x878   :  { %v654_v8 = vpop.f32.mrf.mxu2 }
 0x879   :  { %v655_v9 = vadd.f32 %v654_v8, %v610_v6 }
 0x87b   :  { %v694_v14 = vadd.f32 %v693_v57, %v655_v9 }
 0x87c   :  { %v925_v13 = vpop.f32.mrf.mxu0 }
 0x87d   :  { %991 = vst [vmem:[#allocation11 + $0x30] sm:$0xff] %v694_v14 }
 0x87e   :  { %v964_v17 = vpop.f32.mrf.mxu1 }
 0x87f   :  { %v874_v49 = vpop.f32.mrf.mxu3 }
 0x880   :  { %v658_v19 = vpop.f32.mrf.mxu2 }
 0x881   :  { %v659_v22 = vadd.f32 %v658_v19, %v616_v16 }
 0x883   :  { %v698_v12 = vadd.f32 %v697_v7, %v659_v22 }
 0x884   :  { %v929_v62 = vpop.f32.mrf.mxu0 }
 0x885   :  { %993 = vst [vmem:[#allocation11 + $0x40] sm:$0xff] %v698_v12 }
 0x886   :  { %v968_v5 = vpop.f32.mrf.mxu1 }
 0x887   :  { %v880_v42 = vpop.f32.mrf.mxu3 }
 0x888   :  { %v829_v20 = vpop.f32.mrf.mxu2 }
 0x889   :  { %v830_v37 = vadd.f32 %v829_v20, %v788_v18 }
 0x88b   :  { %v875_v41 = vadd.f32 %v874_v49, %v830_v37 }
 0x88c   :  { %v933_v32 = vpop.f32.mrf.mxu0 }
 0x88d   :  { %v926_v44 = vadd.f32 %v925_v13, %v875_v41 }
 0x88e   :  { %v972_v33 = vpop.f32.mrf.mxu1 }
 0x88f   :  { %v965_v3 = vadd.f32 %v964_v17, %v926_v44  ;;  %v886_v27 = vpop.f32.mrf.mxu3 }
 0x890   :  { %v834_v23 = vpop.f32.mrf.mxu2 }
 0x891   :  { %986 = vst.msk [vmem:[#allocation11 + $0x8] sm:$0xff] %vm75_vm0, %v965_v3  ;;  %v835_v24 = vadd.f32 %v834_v23, %v792_v2 }
 0x893   :  { %v881_v25 = vadd.f32 %v880_v42, %v835_v24 }
 0x894   :  { %v937_v50 = vpop.f32.mrf.mxu0 }
 0x895   :  { %v930_v26 = vadd.f32 %v929_v62, %v881_v25 }
 0x896   :  { %v976_v47 = vpop.f32.mrf.mxu1 }
 0x897   :  { %v969_v31 = vadd.f32 %v968_v5, %v930_v26  ;;  %v892_v39 = vpop.f32.mrf.mxu3 }
 0x898   :  { %v839_v28 = vpop.f32.mrf.mxu2 }
 0x899   :  { %988 = vst.msk [vmem:[#allocation11 + $0x18] sm:$0xff] %vm75_vm0, %v969_v31  ;;  %v840_v29 = vadd.f32 %v839_v28, %v796_v30 }
 0x89b   :  { %v887_v36 = vadd.f32 %v886_v27, %v840_v29 }
 0x89c   :  { %v941_v55 = vpop.f32.mrf.mxu0 }
 0x89d   :  { %v934_v38 = vadd.f32 %v933_v32, %v887_v36 }
 0x89e   :  { %v980_v57 = vpop.f32.mrf.mxu1 }
 0x89f   :  { %v973_v35 = vadd.f32 %v972_v33, %v934_v38  ;;  %v898_v53 = vpop.f32.mrf.mxu3 }
 0x8a0   :  { %v844_v40 = vpop.f32.mrf.mxu2 }
 0x8a1   :  { %990 = vst.msk [vmem:[#allocation11 + $0x28] sm:$0xff] %vm75_vm0, %v973_v35  ;;  %v845_v43 = vadd.f32 %v844_v40, %v800_v34 }
 0x8a3   :  { %v893_v46 = vadd.f32 %v892_v39, %v845_v43 }
 0x8a5   :  { %v938_v21 = vadd.f32 %v937_v50, %v893_v46 }
 0x8a7   :  { %v977_v51 = vadd.f32 %v976_v47, %v938_v21 }
 0x8a8   :  { %v849_v45 = vpop.f32.mrf.mxu2 }
 0x8a9   :  { %992 = vst.msk [vmem:[#allocation11 + $0x38] sm:$0xff] %vm75_vm0, %v977_v51  ;;  %v850_v52 = vadd.f32 %v849_v45, %v804_v48 }
 0x8ab   :  { %v899_v54 = vadd.f32 %v898_v53, %v850_v52 }
 0x8ad   :  { %v942_v56 = vadd.f32 %v941_v55, %v899_v54 }
 0x8af   :  { %v981_v58 = vadd.f32 %v980_v57, %v942_v56 }
 0x8b1   :  { %994 = vst.msk [vmem:[#allocation11 + $0x48] sm:$0xff] %vm75_vm0, %v981_v58 }
 0x8b2   :  { %1029 = dma.vmem_to_hbm [thread:$0]  %s1022_s5, 1280, %s1024_s26, [#allocation10], %s1252_s13, %s1252_s13, %s1253_s14  }
 0x8b3   :  { %1243 = dma.done.wait [#allocation4], 128  }
 0x8b4   :  { %1244 = vsyncadd [#allocation4], 4294967168 }
 0x8b5   :  { %1245 = dma.done.wait [#allocation10], 1408  }
 0x8b6   :  { %1246 = vsyncadd [#allocation10], 4294965888 }
 0x8b7   :  { %1042 = vsyncpa [#allocation3], 1 }
 0x8b8   :  { %1043 = vsyncpa [#allocation6], 1 }
 0x8b9   :  { %1044 = vsyncpa [#allocation4], 1 }
 0x8ba   :  { %1045 = vsyncpa [#allocation10], 1 }

</bundles_post_ra>
